<compile_context>
chip_gen: v7x
topology: tpu7x:2x2x1
jax: 0.10.0
libtpu: 0.0.40
codegen_flags: <defaults>
</compile_context>

<pallas_src>
import functools

import jax
import jax.numpy as jnp
from jax.experimental import pallas as pl
from jax.experimental.pallas import tpu as pltpu

MARGIN = 0.5
EPS = 1e-6  # matches torch.nn.functional.pairwise_distance default eps


def _round_up(x, m):
    return ((x + m - 1) // m) * m


def _contrastive_kernel(x1_ref, x2_ref, lbl_ref, gmat_ref, out_ref, acc_ref, *,
                        margin, eps, fold, n_valid):
    c = pl.program_id(0)          # parallel (TensorCore) axis
    i = pl.program_id(1)          # batch-tile reduction axis
    k = pl.num_programs(1)

    @pl.when(i == 0)
    def _():
        acc_ref[...] = jnp.zeros_like(acc_ref)

    # (tb, DB) lane-dense block; DB = 128 when folded, else DB = D.
    diff = x1_ref[...] - x2_ref[...] + eps
    sq = diff * diff

    # per-original-row squared distance
    if fold > 1:
        # group-sum over each run of D lanes via a tiny MXU matmul -> (tb, fold)
        s = jnp.dot(sq, gmat_ref[...], preferred_element_type=jnp.float32)
    else:
        s = jnp.sum(sq, axis=-1, keepdims=True)                 # (tb, 1)

    d = jnp.sqrt(s)
    hinge = jnp.maximum(margin - d, 0.0)
    lbl = lbl_ref[...]                                          # (tb, fold)
    per_row = (1.0 - lbl) * d * d + lbl * hinge * hinge

    # mask rows that only exist due to lane-folding / tile padding
    tb, f = per_row.shape
    base = (c * k + i) * tb
    r_idx = jax.lax.broadcasted_iota(jnp.int32, (tb, f), 0)
    f_idx = jax.lax.broadcasted_iota(jnp.int32, (tb, f), 1)
    orig = (base + r_idx) * f + f_idx
    per_row = jnp.where(orig < n_valid, per_row, 0.0)

    # resident element-wise accumulator (no per-step scalar reduce)
    acc_ref[...] += per_row

    @pl.when(i == k - 1)
    def _():
        # single cross-lane/sublane reduce per core, written to a lane-dense slab
        out_ref[...] = jnp.broadcast_to(jnp.sum(acc_ref[...]), out_ref.shape)


def contrastive_loss(x1, x2, label, *, margin=MARGIN, vmem_budget_bytes=8 << 20):
    """Mean contrastive loss over the batch.  x1, x2: (B, D); label: (B,) or (B, 1)."""
    B, D = x1.shape
    x1 = x1.astype(jnp.float32)
    x2 = x2.astype(jnp.float32)
    label = label.reshape(-1).astype(jnp.float32)

    # ---- lane-dense folding: pack 128//D rows into the 128-lane axis when possible
    fold = 128 // D if (D < 128 and 128 % D == 0) else 1
    DB = D * fold                                  # in-kernel feature width

    Bp = _round_up(B, fold)
    if Bp != B:
        x1 = jnp.pad(x1, ((0, Bp - B), (0, 0)))
        x2 = jnp.pad(x2, ((0, Bp - B), (0, 0)))
        label = jnp.pad(label, ((0, Bp - B),))
    rows = Bp // fold
    x1f = x1.reshape(rows, DB)
    x2f = x2.reshape(rows, DB)
    lblf = label.reshape(rows, fold)

    # ---- tile size from a portable VMEM budget:
    # x1+x2 blocks (2 arrays x 2 pipeline buffers x f32, lane-padded) + label block + acc
    db_pad = _round_up(DB, 128)
    bytes_per_row = 2 * 2 * db_pad * 4 + 2 * 128 * 4 + 512
    tb_cap = max(8, (vmem_budget_bytes // bytes_per_row) // 8 * 8)

    if rows <= 8:
        ncores, steps, tb = 1, 1, 8                # tiny problem: single grid step
    else:
        ncores = 2 if rows > tb_cap else 1         # 2-TC split (v7x); serial loop elsewhere
        steps = -(-rows // (ncores * tb_cap))      # ceil
        tb = _round_up(-(-rows // (ncores * steps)), 8)
    rows_pad = ncores * steps * tb

    if rows_pad != rows:
        pad = rows_pad - rows
        x1f = jnp.pad(x1f, ((0, pad), (0, 0)))
        x2f = jnp.pad(x2f, ((0, pad), (0, 0)))
        lblf = jnp.pad(lblf, ((0, pad), (0, 0)))

    # block-diagonal grouping matrix for the folded per-row reduction (tiny, resident)
    gmat = (jnp.arange(DB)[:, None] // D == jnp.arange(fold)[None, :]).astype(jnp.float32)

    kernel = functools.partial(_contrastive_kernel, margin=float(margin), eps=EPS,
                               fold=fold, n_valid=B)

    out = pl.pallas_call(
        kernel,
        out_shape=jax.ShapeDtypeStruct((ncores, 8, 128), jnp.float32),
        grid_spec=pltpu.PrefetchScalarGridSpec(
            num_scalar_prefetch=0,
            grid=(ncores, steps),
            in_specs=[
                pl.BlockSpec((tb, DB), lambda c, i: (c * steps + i, 0)),    # x1 tile
                pl.BlockSpec((tb, DB), lambda c, i: (c * steps + i, 0)),    # x2 tile
                pl.BlockSpec((tb, fold), lambda c, i: (c * steps + i, 0)),  # label tile
                pl.BlockSpec((DB, fold), lambda c, i: (0, 0)),              # grouping matrix (resident)
            ],
            # one lane-dense partial-sum slab per core, written once in the epilogue
            out_specs=pl.BlockSpec((1, 8, 128), lambda c, i: (c, 0, 0)),
            scratch_shapes=[pltpu.VMEM((tb, fold), jnp.float32)],
        ),
        compiler_params=pltpu.CompilerParams(
            dimension_semantics=("parallel", "arbitrary"),
            vmem_limit_bytes=32 * 1024 * 1024,
        ),
    )(x1f, x2f, lblf, gmat)

    # add the per-core partial sums and take the batch mean
    return jnp.sum(out[:, 0, 0]) / jnp.float32(B)


def contrastive_loss_ref(x1, x2, label, margin=MARGIN):
    diff = x1.astype(jnp.float32) - x2.astype(jnp.float32) + EPS
    d = jnp.sqrt(jnp.sum(diff * diff, axis=-1))
    return jnp.mean((1.0 - label) * d * d + label * jnp.maximum(margin - d, 0.0) ** 2)


if __name__ == "__main__":
    key = jax.random.PRNGKey(0)
    k1, k2, k3 = jax.random.split(key, 3)

    # shapes implied by the module: a siamese batch of embedding pairs
    B, D = 16, 32
    x1 = jax.random.normal(k1, (B, D), dtype=jnp.float32)
    x2 = jax.random.normal(k2, (B, D), dtype=jnp.float32)
    label = jax.random.bernoulli(k3, 0.5, (B,)).astype(jnp.float32)

    loss = jax.block_until_ready(contrastive_loss(x1, x2, label))
    ref = contrastive_loss_ref(x1, x2, label)
    assert jnp.allclose(loss, ref, rtol=1e-4, atol=1e-5), (loss, ref)

    # exercise the tiled multi-step / 2-core / masked-padding path (tiny budget forces tiles)
    kb1, kb2, kb3 = jax.random.split(jax.random.PRNGKey(1), 3)
    Bb, Db = 1000, 32
    y1 = jax.random.normal(kb1, (Bb, Db), dtype=jnp.float32)
    y2 = jax.random.normal(kb2, (Bb, Db), dtype=jnp.float32)
    lb = jax.random.bernoulli(kb3, 0.5, (Bb,)).astype(jnp.float32)
    loss_b = jax.block_until_ready(contrastive_loss(y1, y2, lb, vmem_budget_bytes=64 * 1024))
    ref_b = contrastive_loss_ref(y1, y2, lb)
    assert jnp.allclose(loss_b, ref_b, rtol=1e-4, atol=1e-5), (loss_b, ref_b)

    # exercise the un-folded path (D does not divide 128)
    kc1, kc2, kc3 = jax.random.split(jax.random.PRNGKey(2), 3)
    Bc, Dc = 40, 48
    z1 = jax.random.normal(kc1, (Bc, Dc), dtype=jnp.float32)
    z2 = jax.random.normal(kc2, (Bc, Dc), dtype=jnp.float32)
    lc = jax.random.bernoulli(kc3, 0.5, (Bc,)).astype(jnp.float32)
    loss_c = jax.block_until_ready(contrastive_loss(z1, z2, lc, vmem_budget_bytes=64 * 1024))
    ref_c = contrastive_loss_ref(z1, z2, lc)
    assert jnp.allclose(loss_c, ref_c, rtol=1e-4, atol=1e-5), (loss_c, ref_c)

    print("KERNEL_OK")
</pallas_src>

<mosaic_0001>
module attributes {stable_mosaic.version = 11 : i64} {
  func.func @_contrastive_kernel(%arg0: i32, %arg1: i32, %arg2: memref<8x128xf32, #tpu.memory_space<vmem>>, %arg3: memref<8x128xf32, #tpu.memory_space<vmem>>, %arg4: memref<8x4xf32, #tpu.memory_space<vmem>>, %arg5: memref<128x4xf32, #tpu.memory_space<vmem>>, %arg6: memref<1x8x128xf32, #tpu.memory_space<vmem>>, %arg7: memref<8x4xf32, #tpu.memory_space<vmem>>) attributes {dimension_semantics = [#tpu.dimension_semantics<parallel>, #tpu.dimension_semantics<arbitrary>], iteration_bounds = array<i64: 1, 1>, scalar_prefetch = 0 : i64, scratch_operands = 1 : i64, tpu.core_type = #tpu.core_type<tc>, window_params = [{transform_indices = @transform_0, window_bounds = array<i64: 8, 128>}, {transform_indices = @transform_1, window_bounds = array<i64: 8, 128>}, {transform_indices = @transform_2, window_bounds = array<i64: 8, 4>}, {pipeline_mode = #tpu.pipeline_mode<synchronous>, transform_indices = @transform_3, window_bounds = array<i64: 128, 4>}, {transform_indices = @transform_4, window_bounds = array<i64: 1, 8, 128>}]} {
    %c0_i32 = arith.constant 0 : i32
    %0 = arith.cmpi eq, %arg1, %c0_i32 : i32
    %1 = arith.extui %0 : i1 to i32
    %c0_i32_0 = arith.constant 0 : i32
    %2 = arith.cmpi ne, %1, %c0_i32_0 : i32
    scf.if %2 {
      %cst_19 = arith.constant 0.000000e+00 : f32
      %44 = vector.broadcast %cst_19 : f32 to vector<8x4xf32>
      %c0_20 = arith.constant 0 : index
      %c0_21 = arith.constant 0 : index
      %45 = vector.load %arg7[%c0_20, %c0_21] : memref<8x4xf32, #tpu.memory_space<vmem>>, vector<8x4xf32>
      tpu.vector_store %arg7[%c0_20, %c0_21], %44 {strides = array<i32>} : memref<8x4xf32, #tpu.memory_space<vmem>>, vector<8x4xf32>,
    } else {
    }
    %c0 = arith.constant 0 : index
    %c0_1 = arith.constant 0 : index
    %3 = vector.load %arg2[%c0, %c0_1] : memref<8x128xf32, #tpu.memory_space<vmem>>, vector<8x128xf32>
    %c0_2 = arith.constant 0 : index
    %c0_3 = arith.constant 0 : index
    %4 = vector.load %arg3[%c0_2, %c0_3] : memref<8x128xf32, #tpu.memory_space<vmem>>, vector<8x128xf32>
    %5 = arith.subf %3, %4 : vector<8x128xf32>
    %cst = arith.constant 9.99999997E-7 : f32
    %6 = vector.broadcast %cst : f32 to vector<8x128xf32>
    %7 = arith.addf %5, %6 : vector<8x128xf32>
    %8 = arith.mulf %7, %7 : vector<8x128xf32>
    %c0_4 = arith.constant 0 : index
    %c0_5 = arith.constant 0 : index
    %9 = vector.load %arg5[%c0_4, %c0_5] : memref<128x4xf32, #tpu.memory_space<vmem>>, vector<128x4xf32>
    %cst_6 = arith.constant dense<0.000000e+00> : vector<8x4xf32>
    %10 = tpu.matmul %8, %9, %cst_6 {dimension_numbers = #tpu.dot_dimension_numbers<[1], [0], [0], [1], [0, 0, 1, 1], [], []>} : vector<8x128xf32>, vector<128x4xf32>, vector<8x4xf32> -> vector<8x4xf32>
    %11 = math.sqrt %10 : vector<8x4xf32>
    %cst_7 = arith.constant 5.000000e-01 : f32
    %12 = vector.broadcast %cst_7 : f32 to vector<8x4xf32>
    %13 = arith.subf %12, %11 : vector<8x4xf32>
    %cst_8 = arith.constant 0.000000e+00 : f32
    %14 = vector.broadcast %cst_8 : f32 to vector<8x4xf32>
    %15 = arith.maximumf %13, %14 : vector<8x4xf32>
    %c0_9 = arith.constant 0 : index
    %c0_10 = arith.constant 0 : index
    %16 = vector.load %arg4[%c0_9, %c0_10] : memref<8x4xf32, #tpu.memory_space<vmem>>, vector<8x4xf32>
    %cst_11 = arith.constant 1.000000e+00 : f32
    %17 = vector.broadcast %cst_11 : f32 to vector<8x4xf32>
    %18 = arith.subf %17, %16 : vector<8x4xf32>
    %19 = arith.mulf %18, %11 : vector<8x4xf32>
    %20 = arith.mulf %19, %11 : vector<8x4xf32>
    %21 = arith.mulf %16, %15 : vector<8x4xf32>
    %22 = arith.mulf %21, %15 : vector<8x4xf32>
    %23 = arith.addf %20, %22 : vector<8x4xf32>
    %c1_i32 = arith.constant 1 : i32
    %24 = arith.muli %arg0, %c1_i32 : i32
    %25 = arith.addi %24, %arg1 : i32
    %c8_i32 = arith.constant 8 : i32
    %26 = arith.muli %25, %c8_i32 : i32
    %27 = tpu.iota {dimensions = array<i32: 0>} : vector<8x4xi32>
    %28 = tpu.iota {dimensions = array<i32: 1>} : vector<8x4xi32>
    %29 = vector.broadcast %26 : i32 to vector<8x4xi32>
    %30 = arith.addi %29, %27 : vector<8x4xi32>
    %c4_i32 = arith.constant 4 : i32
    %31 = vector.broadcast %c4_i32 : i32 to vector<8x4xi32>
    %32 = arith.muli %30, %31 : vector<8x4xi32>
    %33 = arith.addi %32, %28 : vector<8x4xi32>
    %c16_i32 = arith.constant 16 : i32
    %34 = vector.broadcast %c16_i32 : i32 to vector<8x4xi32>
    %35 = arith.cmpi slt, %33, %34 : vector<8x4xi32>
    %cst_12 = arith.constant 0.000000e+00 : f32
    %36 = vector.broadcast %cst_12 : f32 to vector<8x4xf32>
    %37 = arith.select %35, %23, %36 : vector<8x4xi1>, vector<8x4xf32>
    %c0_13 = arith.constant 0 : index
    %c0_14 = arith.constant 0 : index
    %38 = vector.load %arg7[%c0_13, %c0_14] : memref<8x4xf32, #tpu.memory_space<vmem>>, vector<8x4xf32>
    %39 = arith.addf %38, %37 : vector<8x4xf32>
    %c0_15 = arith.constant 0 : index
    %c0_16 = arith.constant 0 : index
    %40 = vector.load %arg7[%c0_15, %c0_16] : memref<8x4xf32, #tpu.memory_space<vmem>>, vector<8x4xf32>
    tpu.vector_store %arg7[%c0_15, %c0_16], %39 {strides = array<i32>} : memref<8x4xf32, #tpu.memory_space<vmem>>, vector<8x4xf32>,
    %c0_i32_17 = arith.constant 0 : i32
    %41 = arith.cmpi eq, %arg1, %c0_i32_17 : i32
    %42 = arith.extui %41 : i1 to i32
    %c0_i32_18 = arith.constant 0 : i32
    %43 = arith.cmpi ne, %42, %c0_i32_18 : i32
    scf.if %43 {
      %c0_19 = arith.constant 0 : index
      %c0_20 = arith.constant 0 : index
      %44 = vector.load %arg7[%c0_19, %c0_20] : memref<8x4xf32, #tpu.memory_space<vmem>>, vector<8x4xf32>
      %45 = vector.shape_cast %44 : vector<8x4xf32> to vector<1x8x4xf32>
      %cst_21 = arith.constant dense<0.000000e+00> : vector<1xf32>
      %46 = vector.multi_reduction <add>, %45, %cst_21 [1, 2] : vector<1x8x4xf32> to vector<1xf32>
      %47 = vector.shape_cast %46 : vector<1xf32> to vector<1x1x1xf32>
      %48 = vector.extract %47[0, 0, 0] : f32 from vector<1x1x1xf32>
      %49 = vector.broadcast %48 : f32 to vector<1x8x128xf32>
      %c0_22 = arith.constant 0 : index
      %c0_23 = arith.constant 0 : index
      %c0_24 = arith.constant 0 : index
      %50 = vector.load %arg6[%c0_22, %c0_23, %c0_24] : memref<1x8x128xf32, #tpu.memory_space<vmem>>, vector<1x8x128xf32>
      tpu.vector_store %arg6[%c0_22, %c0_23, %c0_24], %49 {strides = array<i32>} : memref<1x8x128xf32, #tpu.memory_space<vmem>>, vector<1x8x128xf32>,
    } else {
    }
    return
  }
  func.func @transform_0(%arg0: i32, %arg1: i32) -> (i32, i32) {
    %c1_i32 = arith.constant 1 : i32
    %0 = arith.muli %arg0, %c1_i32 : i32
    %1 = arith.addi %0, %arg1 : i32
    %c0_i32 = arith.constant 0 : i32
    %c0_i32_0 = arith.constant 0 : i32
    return %1, %c0_i32 : i32, i32
  }
  func.func @transform_1(%arg0: i32, %arg1: i32) -> (i32, i32) {
    %c1_i32 = arith.constant 1 : i32
    %0 = arith.muli %arg0, %c1_i32 : i32
    %1 = arith.addi %0, %arg1 : i32
    %c0_i32 = arith.constant 0 : i32
    %c0_i32_0 = arith.constant 0 : i32
    return %1, %c0_i32 : i32, i32
  }
  func.func @transform_2(%arg0: i32, %arg1: i32) -> (i32, i32) {
    %c1_i32 = arith.constant 1 : i32
    %0 = arith.muli %arg0, %c1_i32 : i32
    %1 = arith.addi %0, %arg1 : i32
    %c0_i32 = arith.constant 0 : i32
    %c0_i32_0 = arith.constant 0 : i32
    return %1, %c0_i32 : i32, i32
  }
  func.func @transform_3(%arg0: i32, %arg1: i32) -> (i32, i32) {
    %c0_i32 = arith.constant 0 : i32
    %c0_i32_0 = arith.constant 0 : i32
    %c0_i32_1 = arith.constant 0 : i32
    return %c0_i32, %c0_i32_0 : i32, i32
  }
  func.func @transform_4(%arg0: i32, %arg1: i32) -> (i32, i32, i32) {
    %c0_i32 = arith.constant 0 : i32
    %c0_i32_0 = arith.constant 0 : i32
    %c0_i32_1 = arith.constant 0 : i32
    return %arg0, %c0_i32, %c0_i32_0 : i32, i32, i32
  }
}

</mosaic_0001>

<bundles_post_ra>
// kernel: tpu_custom_call.1
= control target key start
LH: loop header
LB: loop body
LE: loop exit
PB: predicated region body
PF: predicated region fallthrough
CT: control target
= control target key end

     0   :  { %vm73_vm0 = vcmask 31744   ;;  %v354_v3 = vmov 0.0|0.0   ;;  %v355_v6 = vmov 0.0   ;;  %vm356_vm1 = vmmov 0   ;;  %s455_s0 = inlined_call_operand.vmem [shape: f32[8,128], index: 0, kind: input, shape index: {}]   ;;  %s456_s1 = inlined_call_operand.vmem [shape: f32[8,128], index: 1, kind: input, shape index: {}]   ;;  %s457_s2 = inlined_call_operand.vmem [shape: f32[8,4], index: 2, kind: input, shape index: {}]   ;;  %s458_s3 = inlined_call_operand.vmem [shape: f32[128,4], index: 3, kind: input, shape index: {}]   ;;  %s459_s4 = inlined_call_operand.hbm [shape: f32[1,8,128], index: 4, kind: output, shape index: {}]  }
   0x1   :  { %v80_v0 = vld [vmem:[%s458_s3] sm:$0xff]  ;;  %v81_v1 = vld [vmem:[%s458_s3 + $0x8] sm:$0xff]  ;;  %v82_v2 = vld [vmem:[%s458_s3 + $0x10] sm:$0xff]  ;;  %298 = vmatprep.subr.bf16.mxu0 %v354_v3  ;;  %74 = vst.msk [vmem:[#allocation2] sm:$0xff] %vm73_vm0, %v355_v6  ;;  %295 = vmatprep.mubr.msk.f32.mxu0 %vm356_vm1, %v355_v6 }
   0x2   :  { %v299_v4 = vpack.c.bf16 %v81_v1, %v80_v0  ;;  %v83_v5 = vld [vmem:[%s458_s3 + $0x18] sm:$0xff]  ;;  %v84_v8 = vld [vmem:[%s458_s3 + $0x20] sm:$0xff]  ;;  %v85_v9 = vld [vmem:[%s458_s3 + $0x28] sm:$0xff] }
   0x3   :  { %v302_v7 = vpack.c.bf16 %v83_v5, %v82_v2 }
   0x4   :  { %300 = vmatpush3.bf16.msra.mxu0 %v299_v4 }
   0x5   :  { %301 = vmatprep.subr.bf16.mxu0 %v354_v3 }
   0x6   :  { %9 = vsyncpa [#allocation4], 0  ;;  %v305_v10 = vpack.c.bf16 %v85_v9, %v84_v8  ;;  %v86_v11 = vld [vmem:[%s458_s3 + $0x30] sm:$0xff]  ;;  %v87_v12 = vld [vmem:[%s458_s3 + $0x38] sm:$0xff]  ;;  %v184_v33 = vlaneseq }
   0x7   :  { %v308_v13 = vpack.c.bf16 %v87_v12, %v86_v11  ;;  %v88_v14 = vld [vmem:[%s458_s3 + $0x40] sm:$0xff]  ;;  %v89_v15 = vld [vmem:[%s458_s3 + $0x48] sm:$0xff]  ;;  %v90_v17 = vld [vmem:[%s458_s3 + $0x50] sm:$0xff] }
   0x8   :  { %303 = vmatpush3.bf16.msra.mxu0 %v302_v7  ;;  %v311_v16 = vpack.c.bf16 %v89_v15, %v88_v14  ;;  %v91_v18 = vld [vmem:[%s458_s3 + $0x58] sm:$0xff]  ;;  %v75_v20 = vld [vmem:[%s455_s0] sm:$0xff]  ;;  %v93_v23 = vld [vmem:[%s458_s3 + $0x68] sm:$0xff]  ;;  %v185_v36 = vshrl.u32 %v184_v33, 7  ;;  %v187_v42 = vand.u32 127, %v184_v33 }
   0x9   :  { %304 = vmatprep.subr.bf16.mxu0 %v354_v3  ;;  %v314_v19 = vpack.c.bf16 %v91_v18, %v90_v17  ;;  %v76_v21 = vld [vmem:[%s456_s1] sm:$0xff]  ;;  %v94_v26 = vld [vmem:[%s458_s3 + $0x70] sm:$0xff]  ;;  %v95_v27 = vld [vmem:[%s458_s3 + $0x78] sm:$0xff] }
   0xa   :  { %v92_v22 = vld [vmem:[%s458_s3 + $0x60] sm:$0xff]  ;;  %v77_v24 = vsub.f32 %v75_v20, %v76_v21  ;;  %v320_v29 = vpack.c.bf16 %v95_v27, %v94_v26  ;;  %v190_v43 = vmul.u32 4, %v185_v36 }
   0xb   :  { %v317_v25 = vpack.c.bf16 %v93_v23, %v92_v22  ;;  %v175_v35 = vld [vmem:[%s457_s2] sm:$0xff]  ;;  %s357_s2 = smov [#allocation3]  }
   0xc   :  { %306 = vmatpush3.bf16.msra.mxu0 %v305_v10  ;;  %v78_v28 = vadd.f32 1e-06, %v77_v24  ;;  %v176_v40 = vsub.f32 1.0, %v175_v35  ;;  %v191_v47 = vadd.s32 %v190_v43, %v187_v42  ;;  %v194_v52 = vld [vmem:[#allocation2] sm:$0xff]  ;;  %s220_s3 = sshll.u32 %s357_s2, 4  ;;  %s221_s3 = int_to_ptr.vmem [resolvable:$true] %s220_s3 }
   0xd   :  { %307 = vmatprep.subr.bf16.mxu0 %v354_v3  ;;  %s330_s26 = scalar_lea.vmem %s221_s3, 128  ;;  %p335_p1 = scmp.lt.s32.totalorder %s221_s3, %s221_s3 }
   0xe   :  { %v79_v30 = vmul.f32 %v78_v28, %v78_v28  ;;  %vm192_vm4 = vcmp.lt.s32.totalorder %v191_v47, 16  ;;  %p331_p0 = scmp.ne.s32.totalorder %s221_s3, %s330_s26  ;;  %p336_p2 = scmp.lt.s32.totalorder %s330_s26, %s330_s26 }
  0x10   :  { %309 = vmatpush3.bf16.msra.mxu0 %v308_v13  ;;  %p337_p3 = por %p336_p2, %p335_p1 }
  0x11   :  { %310 = vmatprep.subr.bf16.mxu0 %v354_v3 }
  0x12   :  { %p338_p4 = pnand %p337_p3, %p331_p0 }
  0x14   :  { %312 = vmatpush3.bf16.msra.mxu0 %v311_v16 }
  0x15   :  { %313 = vmatprep.subr.bf16.mxu0 %v354_v3 }
  0x18   :  { %315 = vmatpush3.bf16.msra.mxu0 %v314_v19 }
  0x19   :  { %316 = vmatprep.subr.bf16.mxu0 %v354_v3 }
  0x1c   :  { %318 = vmatpush3.bf16.msra.mxu0 %v317_v25 }
  0x1d   :  { %319 = vmatprep.subr.bf16.mxu0 %v354_v3 }
  0x20   :  { %321 = vmatpush3.bf16.msra.mxu0 %v320_v29 }
  0x23   :  { %296 = vmatmul.mubr.f32.vlgmr.msra.gmra.mrb[0].mxu0 %v79_v30 }
  0xf6   :  { %v162_v31 = vpop.f32.mrb[0].mxu0 }
  0xf7   :  { %328 = vrsqrt.f32 %v162_v31  ;;  %v297_v32 = vpop.f32.mrb[1].mxu0  ;;  %vm168_vm2 = vcmp.eq.f32.partialorder %v162_v31, inf  ;;  %v171_v38 = vand.u32 2147483648, %v162_v31  ;;  %vm170_vm3 = vcmp.eq.f32.partialorder %v162_v31, 0.0 }
 0x101   :  { %v329_v34 = vpop.eup %328 }
 0x102   :  { %v167_v37 = vmul.f32 %v329_v34, %v162_v31 }
 0x104   :  { %v169_v39 = vsel %vm168_vm2, %v162_v31, %v167_v37 }
 0x105   :  { %v172_v41 = vsel %vm170_vm3, %v171_v38, %v169_v39 }
 0x106   :  { %v173_v44 = vsub.f32 0.5, %v172_v41  ;;  %v177_v46 = vmul.f32 %v176_v40, %v172_v41 }
 0x108   :  { %v174_v45 = vmax.f32 %v173_v44, 0.0  ;;  %v178_v49 = vmul.f32 %v177_v46, %v172_v41 }
 0x10a   :  { %v179_v48 = vmul.f32 %v175_v35, %v174_v45 }
 0x10c   :  { %v180_v50 = vmul.f32 %v179_v48, %v174_v45 }
 0x10e   :  { %v181_v51 = vadd.f32 %v180_v50, %v178_v49 }
 0x110   :  { %v193_v53 = vsel %vm192_vm4, %v181_v51, 0.0 }
 0x111   :  { %v195_v54 = vadd.f32 %v194_v52, %v193_v53 }
 0x113   :  { %197 = vst.msk [vmem:[#allocation2] sm:$0xff] %vm73_vm0, %v195_v54 }
 0x11a   :  { %v201_v55 = vld [vmem:[#allocation2] sm:$0xff] }
 0x11b   :  { %v202_v56 = vsel %vm73_vm0, %v201_v55, 0.0 }
 0x11c   :  { %203 = vadd.xlane.f32.xlu0 %v202_v56 }
 0x1a9   :  { %v204_v57 = vpop.xlane.xlu0 %203 }
 0x1aa   :  { %v205_v58 = vrot.slane %v204_v57, 4 }
 0x1ac   :  { %v206_v59 = vadd.f32 %v205_v58, %v204_v57 }
 0x1ae   :  { %v207_v60 = vrot.slane %v206_v59, 2 }
 0x1b0   :  { %v208_v61 = vadd.f32 %v207_v60, %v206_v59 }
 0x1b2   :  { %v209_v62 = vrot.slane %v208_v61, 1 }
 0x1b4   :  { %v210_v63 = vadd.f32 %v209_v62, %v208_v61 }
 0x1b6   :  { %322 = vpush %v210_v63 }
 0x1e7   :  { %s323_s25 = spop %322 }
 0x1e8   :  { %v212_v0 = vstv %s323_s25 }
 0x1e9   :  { %213 = vst [vmem:[#allocation3] sm:$0xff] %v212_v0 }
 0x1ea   :  { %341 = shalt.err (!%p338_p4)
}
 0x1eb   :  { %s342_s29 = scalar_lea.hbm %s459_s4, 128 }
 0x1ec   :  { %p343_p5 = scmp.ne.s32.totalorder %s459_s4, %s342_s29  ;;  %p346_p6 = scmp.lt.u32.totalorder %s342_s29, %s459_s4 }
 0x1ee   :  { %p348_p7 = pnand %p346_p6, %p343_p5 }
 0x1f0   :  { %351 = shalt.err (!%p348_p7)
}
 0x1f1   :  { %223 = dma.vmem_to_hbm [thread:$0]  %s221_s3, 128, %s459_s4, [#allocation4]  }
 0x1f2   :  { %352 = dma.done.wait [#allocation4], 128  }
 0x1f3   :  { %353 = vsyncadd [#allocation4], 4294967168 }
 0x1f4   :  { %227 = vsyncpa [#allocation4], 1 }

</bundles_post_ra>
